<compile_context>
chip_gen: v7x
topology: tpu7x:2x2x1
jax: 0.10.0
libtpu: 0.0.40
codegen_flags: <defaults>
</compile_context>

<pallas_src>
import functools

import jax
import jax.numpy as jnp
from jax.experimental import pallas as pl
from jax.experimental.pallas import tpu as pltpu


# ----------------------------------------------------------------------------
# helpers
# ----------------------------------------------------------------------------
_SINGLE_PASS_LIVE_VMEM_BUDGET = 24 << 20  # 2x in + 2x out double buffers


def _pick_row_tile(C, H, W, itemsize, target_bytes):
    """Largest row tile th that divides H, keeps the flat block lane-legal
    ((th*W) % 128 == 0 or th == H) and <= target_bytes; else smallest legal."""
    candidates = [d for d in range(1, H + 1)
                  if H % d == 0 and ((d * W) % 128 == 0 or d == H)]
    fitting = [d for d in candidates if C * d * W * itemsize <= target_bytes]
    return max(fitting) if fitting else min(candidates)


def _vmem_limit(live_bytes):
    # explicit scoped-VMEM limit: measured need + headroom, capped for v7x.
    return int(min(max(live_bytes + (4 << 20), 16 << 20), 64 << 20))


# ----------------------------------------------------------------------------
# Phase A: pooled strips + tiny gate convs (two-phase path)
# ----------------------------------------------------------------------------
def _gate_kernel(x_ref, mh_ref, w1_ref, b1_ref, wh_ref, bh_ref, ww_ref, bw_ref,
                 sh_ref, sw_ref, xh_acc, xw_acc, *, H, W, th, n_tiles):
    j = pl.program_id(1)
    xb = x_ref[0].astype(jnp.float32)              # (C, th*W) flat rows

    # Partial pooled strips for this tile of `th` image rows.
    col_sum = xb[:, 0:W]                           # running sum over rows
    for i in range(1, th):
        col_sum = col_sum + xb[:, i * W:(i + 1) * W]
    # per-row means over W via one small MXU matmul with the pooling matrix
    row_mean = jnp.dot(xb, mh_ref[...], preferred_element_type=jnp.float32)  # (C, th)

    @pl.when(j == 0)
    def _():
        xw_acc[...] = jnp.zeros_like(xw_acc)

    xw_acc[...] += col_sum                         # accumulate sum over H
    xh_acc[j] = row_mean                           # per-tile x_h slot

    @pl.when(j == n_tiles - 1)
    def _():
        if n_tiles == 1:
            x_h = xh_acc[0]                                          # (C, H)
        else:
            x_h = jnp.concatenate([xh_acc[t] for t in range(n_tiles)], axis=1)
        x_w = xw_acc[...] * (1.0 / H)                                # (C, W)
        w1 = w1_ref[...]
        b1 = b1_ref[...]
        y_h = jnp.maximum(
            jnp.dot(w1, x_h, preferred_element_type=jnp.float32) + b1, 0.0)
        y_w = jnp.maximum(
            jnp.dot(w1, x_w, preferred_element_type=jnp.float32) + b1, 0.0)
        sh_ref[0] = jax.nn.sigmoid(
            jnp.dot(wh_ref[...], y_h, preferred_element_type=jnp.float32)
            + bh_ref[...])
        sw_ref[0] = jax.nn.sigmoid(
            jnp.dot(ww_ref[...], y_w, preferred_element_type=jnp.float32)
            + bw_ref[...])


# ----------------------------------------------------------------------------
# Phase B: lane-dense elementwise apply (two-phase path)
# ----------------------------------------------------------------------------
def _apply_kernel(x_ref, sh_ref, sw_ref, out_ref, *, W, th):
    xb = x_ref[0]                                  # (C, th*W)
    sh = sh_ref[0, 0]                              # (C, th) gate rows for tile
    sw = sw_ref[0]                                 # (C, W)
    # gate[c, i*W + w] = sh[c, i] * sw[c, w], built without any reshape:
    pieces = [sh[:, i:i + 1] * sw for i in range(th)]
    gate = pieces[0] if th == 1 else jnp.concatenate(pieces, axis=1)
    out_ref[0] = (xb * gate).astype(out_ref.dtype)


# ----------------------------------------------------------------------------
# Single-pass per-batch kernel (minimum HBM traffic; used when W % 128 == 0
# and the whole image fits VMEM comfortably)
# ----------------------------------------------------------------------------
def _single_pass_kernel(x_ref, w1_ref, b1_ref, wh_ref, bh_ref, ww_ref, bw_ref,
                        out_ref):
    x = x_ref[0].astype(jnp.float32)               # (C, H, W)
    x_h = jnp.mean(x, axis=2)                      # (C, H)
    x_w = jnp.mean(x, axis=1)                      # (C, W)
    w1 = w1_ref[...]
    b1 = b1_ref[...]
    # two matmuls against the shared reduce weight (no concat/slice round trip)
    y_h = jnp.maximum(
        jnp.dot(w1, x_h, preferred_element_type=jnp.float32) + b1, 0.0)
    y_w = jnp.maximum(
        jnp.dot(w1, x_w, preferred_element_type=jnp.float32) + b1, 0.0)
    s_h = jax.nn.sigmoid(
        jnp.dot(wh_ref[...], y_h, preferred_element_type=jnp.float32)
        + bh_ref[...])
    s_w = jax.nn.sigmoid(
        jnp.dot(ww_ref[...], y_w, preferred_element_type=jnp.float32)
        + bw_ref[...])
    out_ref[0] = (x * s_h[:, :, None] * s_w[:, None, :]).astype(out_ref.dtype)


# ----------------------------------------------------------------------------
# wrappers
# ----------------------------------------------------------------------------
def _two_phase(x, w1, b1, wh, bh, ww, bw, tile_bytes):
    N, C, H, W = x.shape
    mid = w1.shape[0]
    itemsize = jnp.dtype(x.dtype).itemsize
    th = _pick_row_tile(C, H, W, itemsize, tile_bytes)
    n_tiles = H // th
    tile_b = C * th * W * itemsize

    x_flat = x.reshape(N, C, H * W)                # contiguous -> free reshape
    # row-mean pooling matrix: mh[i*W + w, i] = 1/W
    mh = jnp.repeat(jnp.eye(th, dtype=jnp.float32), W, axis=0) / float(W)

    const = lambda shp: pl.BlockSpec(shp, lambda n, j: (0, 0))

    s_h, s_w = pl.pallas_call(
        functools.partial(_gate_kernel, H=H, W=W, th=th, n_tiles=n_tiles),
        out_shape=(jax.ShapeDtypeStruct((N, C, H), jnp.float32),
                   jax.ShapeDtypeStruct((N, C, W), jnp.float32)),
        grid_spec=pltpu.PrefetchScalarGridSpec(
            num_scalar_prefetch=0,
            grid=(N, n_tiles),
            in_specs=[
                pl.BlockSpec((1, C, th * W), lambda n, j: (n, 0, j)),
                const((th * W, th)),
                const((mid, C)), const((mid, 1)),
                const((C, mid)), const((C, 1)),
                const((C, mid)), const((C, 1)),
            ],
            out_specs=(pl.BlockSpec((1, C, H), lambda n, j: (n, 0, 0)),
                       pl.BlockSpec((1, C, W), lambda n, j: (n, 0, 0))),
            scratch_shapes=[pltpu.VMEM((n_tiles, C, th), jnp.float32),
                            pltpu.VMEM((C, W), jnp.float32)],
        ),
        compiler_params=pltpu.CompilerParams(
            dimension_semantics=("parallel", "arbitrary"),
            vmem_limit_bytes=_vmem_limit(2 * tile_b)),
    )(x_flat, mh, w1, b1, wh, bh, ww, bw)

    # tiny re-layout of the H-gate so apply-phase blocks are lane-legal
    s_h_tiles = s_h.reshape(N, C, n_tiles, th).transpose(0, 2, 1, 3)  # (N,nJ,C,th)

    out_flat = pl.pallas_call(
        functools.partial(_apply_kernel, W=W, th=th),
        out_shape=jax.ShapeDtypeStruct((N, C, H * W), x.dtype),
        grid_spec=pltpu.PrefetchScalarGridSpec(
            num_scalar_prefetch=0,
            grid=(N, n_tiles),
            in_specs=[
                pl.BlockSpec((1, C, th * W), lambda n, j: (n, 0, j)),
                pl.BlockSpec((1, 1, C, th), lambda n, j: (n, j, 0, 0)),
                pl.BlockSpec((1, C, W), lambda n, j: (n, 0, 0)),
            ],
            out_specs=pl.BlockSpec((1, C, th * W), lambda n, j: (n, 0, j)),
        ),
        compiler_params=pltpu.CompilerParams(
            dimension_semantics=("parallel", "parallel"),
            vmem_limit_bytes=_vmem_limit(4 * tile_b)),
    )(x_flat, s_h_tiles, s_w)

    return out_flat.reshape(N, C, H, W)


def _single_pass(x, w1, b1, wh, bh, ww, bw):
    N, C, H, W = x.shape
    mid = w1.shape[0]
    itemsize = jnp.dtype(x.dtype).itemsize
    block_b = C * H * W * itemsize
    const = lambda shp: pl.BlockSpec(shp, lambda n: (0, 0))
    return pl.pallas_call(
        _single_pass_kernel,
        out_shape=jax.ShapeDtypeStruct((N, C, H, W), x.dtype),
        grid_spec=pltpu.PrefetchScalarGridSpec(
            num_scalar_prefetch=0,
            grid=(N,),
            in_specs=[
                pl.BlockSpec((1, C, H, W), lambda n: (n, 0, 0, 0)),
                const((mid, C)), const((mid, 1)),
                const((C, mid)), const((C, 1)),
                const((C, mid)), const((C, 1)),
            ],
            out_specs=pl.BlockSpec((1, C, H, W), lambda n: (n, 0, 0, 0)),
        ),
        compiler_params=pltpu.CompilerParams(
            dimension_semantics=("parallel",),
            vmem_limit_bytes=_vmem_limit(4 * block_b)),
    )(x, w1, b1, wh, bh, ww, bw)


def coordinate_attention(x, w1, b1, wh, bh, ww, bw, *, force_two_phase=False,
                         two_phase_tile_bytes=1 << 20):
    """x: (N, C, H, W). Weights are 1x1-conv kernels as 2D matrices:
    w1 (mid, C), wh (C, mid), ww (C, mid); biases b1 (mid,1), bh (C,1), bw (C,1)."""
    N, C, H, W = x.shape
    itemsize = jnp.dtype(x.dtype).itemsize
    single_ok = (not force_two_phase
                 and W % 128 == 0
                 and 4 * C * H * W * itemsize <= _SINGLE_PASS_LIVE_VMEM_BUDGET)
    if single_ok:
        return _single_pass(x, w1, b1, wh, bh, ww, bw)
    return _two_phase(x, w1, b1, wh, bh, ww, bw, two_phase_tile_bytes)


# ----------------------------------------------------------------------------
# pure-JAX reference (mirrors the PyTorch forward)
# ----------------------------------------------------------------------------
def coordinate_attention_ref(x, w1, b1, wh, bh, ww, bw):
    x_h = jnp.mean(x, axis=3)                       # (N, C, H)
    x_w = jnp.mean(x, axis=2)                       # (N, C, W)
    y_h = jnp.maximum(jnp.einsum('mc,nch->nmh', w1, x_h) + b1[None], 0.0)
    y_w = jnp.maximum(jnp.einsum('mc,ncw->nmw', w1, x_w) + b1[None], 0.0)
    s_h = jax.nn.sigmoid(jnp.einsum('cm,nmh->nch', wh, y_h) + bh[None])
    s_w = jax.nn.sigmoid(jnp.einsum('cm,nmw->ncw', ww, y_w) + bw[None])
    return x * s_h[:, :, :, None] * s_w[:, :, None, :]


if __name__ == "__main__":
    def make_inputs(key, N, C, H, W, reduction=16):
        mid = max(1, C // reduction)
        ks = jax.random.split(key, 7)
        x = jax.random.normal(ks[0], (N, C, H, W), dtype=jnp.float32)
        w1 = jax.random.normal(ks[1], (mid, C), dtype=jnp.float32) * 0.1
        b1 = jax.random.normal(ks[2], (mid, 1), dtype=jnp.float32) * 0.1
        wh = jax.random.normal(ks[3], (C, mid), dtype=jnp.float32) * 0.1
        bh = jax.random.normal(ks[4], (C, 1), dtype=jnp.float32) * 0.1
        ww = jax.random.normal(ks[5], (C, mid), dtype=jnp.float32) * 0.1
        bw = jax.random.normal(ks[6], (C, 1), dtype=jnp.float32) * 0.1
        return x, w1, b1, wh, bh, ww, bw

    key = jax.random.PRNGKey(0)
    k1, k2 = jax.random.split(key)

    # Case 1: narrow image (W=16) -> lane-dense flat two-phase path.
    args1 = make_inputs(k1, 2, 32, 16, 16)
    out1 = jax.block_until_ready(coordinate_attention(*args1))
    ref1 = coordinate_attention_ref(*args1)
    assert out1.shape == args1[0].shape
    assert jnp.allclose(out1, ref1, atol=1e-5, rtol=1e-5), "two-phase mismatch"

    # Case 1b: same inputs, tiny tile budget -> exercises multi-tile pooling
    # accumulation (n_tiles > 1) in the gate kernel.
    out1b = jax.block_until_ready(
        coordinate_attention(*args1, force_two_phase=True,
                             two_phase_tile_bytes=4096))
    assert jnp.allclose(out1b, ref1, atol=1e-5, rtol=1e-5), "tiled mismatch"

    # Case 2: 128-wide image that fits VMEM -> single-pass (2x traffic) path.
    args2 = make_inputs(k2, 1, 32, 8, 128)
    out2 = jax.block_until_ready(coordinate_attention(*args2))
    ref2 = coordinate_attention_ref(*args2)
    assert jnp.allclose(out2, ref2, atol=1e-5, rtol=1e-5), "single-pass mismatch"

    print("KERNEL_OK")
</pallas_src>

<mosaic_0001>
module attributes {stable_mosaic.version = 11 : i64} {
  func.func @_gate_kernel(%arg0: i32, %arg1: i32, %arg2: memref<1x32x256xf32, #tpu.memory_space<vmem>>, %arg3: memref<256x16xf32, #tpu.memory_space<vmem>>, %arg4: memref<2x32xf32, #tpu.memory_space<vmem>>, %arg5: memref<2x1xf32, #tpu.memory_space<vmem>>, %arg6: memref<32x2xf32, #tpu.memory_space<vmem>>, %arg7: memref<32x1xf32, #tpu.memory_space<vmem>>, %arg8: memref<32x2xf32, #tpu.memory_space<vmem>>, %arg9: memref<32x1xf32, #tpu.memory_space<vmem>>, %arg10: memref<1x32x16xf32, #tpu.memory_space<vmem>>, %arg11: memref<1x32x16xf32, #tpu.memory_space<vmem>>, %arg12: memref<1x32x16xf32, #tpu.memory_space<vmem>>, %arg13: memref<32x16xf32, #tpu.memory_space<vmem>>) attributes {dimension_semantics = [#tpu.dimension_semantics<parallel>, #tpu.dimension_semantics<arbitrary>], iteration_bounds = array<i64: 2, 1>, scalar_prefetch = 0 : i64, scratch_operands = 2 : i64, tpu.core_type = #tpu.core_type<tc>, window_params = [{transform_indices = @transform_0, window_bounds = array<i64: 1, 32, 256>}, {pipeline_mode = #tpu.pipeline_mode<synchronous>, transform_indices = @transform_1, window_bounds = array<i64: 256, 16>}, {pipeline_mode = #tpu.pipeline_mode<synchronous>, transform_indices = @transform_2, window_bounds = array<i64: 2, 32>}, {pipeline_mode = #tpu.pipeline_mode<synchronous>, transform_indices = @transform_3, window_bounds = array<i64: 2, 1>}, {pipeline_mode = #tpu.pipeline_mode<synchronous>, transform_indices = @transform_4, window_bounds = array<i64: 32, 2>}, {pipeline_mode = #tpu.pipeline_mode<synchronous>, transform_indices = @transform_5, window_bounds = array<i64: 32, 1>}, {pipeline_mode = #tpu.pipeline_mode<synchronous>, transform_indices = @transform_6, window_bounds = array<i64: 32, 2>}, {pipeline_mode = #tpu.pipeline_mode<synchronous>, transform_indices = @transform_7, window_bounds = array<i64: 32, 1>}, {transform_indices = @transform_8, window_bounds = array<i64: 1, 32, 16>}, {transform_indices = @transform_9, window_bounds = array<i64: 1, 32, 16>}]} {
    %c0 = arith.constant 0 : index
    %c0_0 = arith.constant 0 : index
    %c0_1 = arith.constant 0 : index
    %0 = vector.load %arg2[%c0, %c0_0, %c0_1] : memref<1x32x256xf32, #tpu.memory_space<vmem>>, vector<1x32x256xf32>
    %1 = vector.shape_cast %0 : vector<1x32x256xf32> to vector<32x256xf32>
    %2 = vector.extract_strided_slice %1 {offsets = [0, 0], sizes = [32, 16], strides = [1, 1]} : vector<32x256xf32> to vector<32x16xf32>
    %3 = vector.extract_strided_slice %1 {offsets = [0, 16], sizes = [32, 16], strides = [1, 1]} : vector<32x256xf32> to vector<32x16xf32>
    %4 = arith.addf %2, %3 : vector<32x16xf32>
    %5 = vector.extract_strided_slice %1 {offsets = [0, 32], sizes = [32, 16], strides = [1, 1]} : vector<32x256xf32> to vector<32x16xf32>
    %6 = arith.addf %4, %5 : vector<32x16xf32>
    %7 = vector.extract_strided_slice %1 {offsets = [0, 48], sizes = [32, 16], strides = [1, 1]} : vector<32x256xf32> to vector<32x16xf32>
    %8 = arith.addf %6, %7 : vector<32x16xf32>
    %9 = vector.extract_strided_slice %1 {offsets = [0, 64], sizes = [32, 16], strides = [1, 1]} : vector<32x256xf32> to vector<32x16xf32>
    %10 = arith.addf %8, %9 : vector<32x16xf32>
    %11 = vector.extract_strided_slice %1 {offsets = [0, 80], sizes = [32, 16], strides = [1, 1]} : vector<32x256xf32> to vector<32x16xf32>
    %12 = arith.addf %10, %11 : vector<32x16xf32>
    %13 = vector.extract_strided_slice %1 {offsets = [0, 96], sizes = [32, 16], strides = [1, 1]} : vector<32x256xf32> to vector<32x16xf32>
    %14 = arith.addf %12, %13 : vector<32x16xf32>
    %15 = vector.extract_strided_slice %1 {offsets = [0, 112], sizes = [32, 16], strides = [1, 1]} : vector<32x256xf32> to vector<32x16xf32>
    %16 = arith.addf %14, %15 : vector<32x16xf32>
    %17 = vector.extract_strided_slice %1 {offsets = [0, 128], sizes = [32, 16], strides = [1, 1]} : vector<32x256xf32> to vector<32x16xf32>
    %18 = arith.addf %16, %17 : vector<32x16xf32>
    %19 = vector.extract_strided_slice %1 {offsets = [0, 144], sizes = [32, 16], strides = [1, 1]} : vector<32x256xf32> to vector<32x16xf32>
    %20 = arith.addf %18, %19 : vector<32x16xf32>
    %21 = vector.extract_strided_slice %1 {offsets = [0, 160], sizes = [32, 16], strides = [1, 1]} : vector<32x256xf32> to vector<32x16xf32>
    %22 = arith.addf %20, %21 : vector<32x16xf32>
    %23 = vector.extract_strided_slice %1 {offsets = [0, 176], sizes = [32, 16], strides = [1, 1]} : vector<32x256xf32> to vector<32x16xf32>
    %24 = arith.addf %22, %23 : vector<32x16xf32>
    %25 = vector.extract_strided_slice %1 {offsets = [0, 192], sizes = [32, 16], strides = [1, 1]} : vector<32x256xf32> to vector<32x16xf32>
    %26 = arith.addf %24, %25 : vector<32x16xf32>
    %27 = vector.extract_strided_slice %1 {offsets = [0, 208], sizes = [32, 16], strides = [1, 1]} : vector<32x256xf32> to vector<32x16xf32>
    %28 = arith.addf %26, %27 : vector<32x16xf32>
    %29 = vector.extract_strided_slice %1 {offsets = [0, 224], sizes = [32, 16], strides = [1, 1]} : vector<32x256xf32> to vector<32x16xf32>
    %30 = arith.addf %28, %29 : vector<32x16xf32>
    %31 = vector.extract_strided_slice %1 {offsets = [0, 240], sizes = [32, 16], strides = [1, 1]} : vector<32x256xf32> to vector<32x16xf32>
    %32 = arith.addf %30, %31 : vector<32x16xf32>
    %c0_2 = arith.constant 0 : index
    %c0_3 = arith.constant 0 : index
    %33 = vector.load %arg3[%c0_2, %c0_3] : memref<256x16xf32, #tpu.memory_space<vmem>>, vector<256x16xf32>
    %cst = arith.constant dense<0.000000e+00> : vector<32x16xf32>
    %34 = tpu.matmul %1, %33, %cst {dimension_numbers = #tpu.dot_dimension_numbers<[1], [0], [0], [1], [0, 0, 1, 1], [], []>} : vector<32x256xf32>, vector<256x16xf32>, vector<32x16xf32> -> vector<32x16xf32>
    %c0_i32 = arith.constant 0 : i32
    %35 = arith.cmpi eq, %arg1, %c0_i32 : i32
    %36 = arith.extui %35 : i1 to i32
    %c0_i32_4 = arith.constant 0 : i32
    %37 = arith.cmpi ne, %36, %c0_i32_4 : i32
    scf.if %37 {
      %cst_13 = arith.constant 0.000000e+00 : f32
      %48 = vector.broadcast %cst_13 : f32 to vector<32x16xf32>
      %c0_14 = arith.constant 0 : index
      %c0_15 = arith.constant 0 : index
      %49 = vector.load %arg13[%c0_14, %c0_15] : memref<32x16xf32, #tpu.memory_space<vmem>>, vector<32x16xf32>
      tpu.vector_store %arg13[%c0_14, %c0_15], %48 {strides = array<i32>} : memref<32x16xf32, #tpu.memory_space<vmem>>, vector<32x16xf32>,
    } else {
    }
    %c0_5 = arith.constant 0 : index
    %c0_6 = arith.constant 0 : index
    %38 = vector.load %arg13[%c0_5, %c0_6] : memref<32x16xf32, #tpu.memory_space<vmem>>, vector<32x16xf32>
    %39 = arith.addf %38, %32 : vector<32x16xf32>
    %c0_7 = arith.constant 0 : index
    %c0_8 = arith.constant 0 : index
    %40 = vector.load %arg13[%c0_7, %c0_8] : memref<32x16xf32, #tpu.memory_space<vmem>>, vector<32x16xf32>
    tpu.vector_store %arg13[%c0_7, %c0_8], %39 {strides = array<i32>} : memref<32x16xf32, #tpu.memory_space<vmem>>, vector<32x16xf32>,
    %41 = arith.index_cast %arg1 : i32 to index
    %c0_9 = arith.constant 0 : index
    %c0_10 = arith.constant 0 : index
    %42 = vector.load %arg12[%41, %c0_9, %c0_10] : memref<1x32x16xf32, #tpu.memory_space<vmem>>, vector<1x32x16xf32>
    %43 = vector.shape_cast %42 : vector<1x32x16xf32> to vector<32x16xf32>
    %44 = vector.shape_cast %34 : vector<32x16xf32> to vector<1x32x16xf32>
    tpu.vector_store %arg12[%41, %c0_9, %c0_10], %44 {strides = array<i32>} : memref<1x32x16xf32, #tpu.memory_space<vmem>>, vector<1x32x16xf32>,
    %c0_i32_11 = arith.constant 0 : i32
    %45 = arith.cmpi eq, %arg1, %c0_i32_11 : i32
    %46 = arith.extui %45 : i1 to i32
    %c0_i32_12 = arith.constant 0 : i32
    %47 = arith.cmpi ne, %46, %c0_i32_12 : i32
    scf.if %47 {
      %c0_13 = arith.constant 0 : index
      %c0_14 = arith.constant 0 : index
      %c0_15 = arith.constant 0 : index
      %48 = vector.load %arg12[%c0_13, %c0_14, %c0_15] : memref<1x32x16xf32, #tpu.memory_space<vmem>>, vector<1x32x16xf32>
      %49 = vector.shape_cast %48 : vector<1x32x16xf32> to vector<32x16xf32>
      %c0_16 = arith.constant 0 : index
      %c0_17 = arith.constant 0 : index
      %50 = vector.load %arg13[%c0_16, %c0_17] : memref<32x16xf32, #tpu.memory_space<vmem>>, vector<32x16xf32>
      %cst_18 = arith.constant 6.250000e-02 : f32
      %51 = vector.broadcast %cst_18 : f32 to vector<32x16xf32>
      %52 = arith.mulf %50, %51 : vector<32x16xf32>
      %c0_19 = arith.constant 0 : index
      %c0_20 = arith.constant 0 : index
      %53 = vector.load %arg4[%c0_19, %c0_20] : memref<2x32xf32, #tpu.memory_space<vmem>>, vector<2x32xf32>
      %c0_21 = arith.constant 0 : index
      %c0_22 = arith.constant 0 : index
      %54 = vector.load %arg5[%c0_21, %c0_22] : memref<2x1xf32, #tpu.memory_space<vmem>>, vector<2x1xf32>
      %cst_23 = arith.constant dense<0.000000e+00> : vector<2x16xf32>
      %55 = tpu.matmul %53, %49, %cst_23 {dimension_numbers = #tpu.dot_dimension_numbers<[1], [0], [0], [1], [0, 0, 1, 1], [], []>} : vector<2x32xf32>, vector<32x16xf32>, vector<2x16xf32> -> vector<2x16xf32>
      %56 = vector.broadcast %54 : vector<2x1xf32> to vector<2x16xf32>
      %57 = arith.addf %55, %56 : vector<2x16xf32>
      %cst_24 = arith.constant 0.000000e+00 : f32
      %58 = vector.broadcast %cst_24 : f32 to vector<2x16xf32>
      %59 = arith.maximumf %57, %58 : vector<2x16xf32>
      %cst_25 = arith.constant dense<0.000000e+00> : vector<2x16xf32>
      %60 = tpu.matmul %53, %52, %cst_25 {dimension_numbers = #tpu.dot_dimension_numbers<[1], [0], [0], [1], [0, 0, 1, 1], [], []>} : vector<2x32xf32>, vector<32x16xf32>, vector<2x16xf32> -> vector<2x16xf32>
      %61 = vector.broadcast %54 : vector<2x1xf32> to vector<2x16xf32>
      %62 = arith.addf %60, %61 : vector<2x16xf32>
      %cst_26 = arith.constant 0.000000e+00 : f32
      %63 = vector.broadcast %cst_26 : f32 to vector<2x16xf32>
      %64 = arith.maximumf %62, %63 : vector<2x16xf32>
      %c0_27 = arith.constant 0 : index
      %c0_28 = arith.constant 0 : index
      %65 = vector.load %arg6[%c0_27, %c0_28] : memref<32x2xf32, #tpu.memory_space<vmem>>, vector<32x2xf32>
      %cst_29 = arith.constant dense<0.000000e+00> : vector<32x16xf32>
      %66 = tpu.matmul %65, %59, %cst_29 {dimension_numbers = #tpu.dot_dimension_numbers<[1], [0], [0], [1], [0, 0, 1, 1], [], []>} : vector<32x2xf32>, vector<2x16xf32>, vector<32x16xf32> -> vector<32x16xf32>
      %c0_30 = arith.constant 0 : index
      %c0_31 = arith.constant 0 : index
      %67 = vector.load %arg7[%c0_30, %c0_31] : memref<32x1xf32, #tpu.memory_space<vmem>>, vector<32x1xf32>
      %68 = vector.broadcast %67 : vector<32x1xf32> to vector<32x16xf32>
      %69 = arith.addf %66, %68 : vector<32x16xf32>
      %70 = arith.negf %69 : vector<32x16xf32>
      %71 = math.exp %70 : vector<32x16xf32>
      %cst_32 = arith.constant 1.000000e+00 : f32
      %72 = vector.broadcast %cst_32 : f32 to vector<32x16xf32>
      %73 = arith.addf %72, %71 : vector<32x16xf32>
      %74 = arith.divf %72, %73 : vector<32x16xf32>
      %c0_33 = arith.constant 0 : index
      %c0_34 = arith.constant 0 : index
      %c0_35 = arith.constant 0 : index
      %75 = vector.load %arg10[%c0_33, %c0_34, %c0_35] : memref<1x32x16xf32, #tpu.memory_space<vmem>>, vector<1x32x16xf32>
      %76 = vector.shape_cast %75 : vector<1x32x16xf32> to vector<32x16xf32>
      %77 = vector.shape_cast %74 : vector<32x16xf32> to vector<1x32x16xf32>
      tpu.vector_store %arg10[%c0_33, %c0_34, %c0_35], %77 {strides = array<i32>} : memref<1x32x16xf32, #tpu.memory_space<vmem>>, vector<1x32x16xf32>,
      %c0_36 = arith.constant 0 : index
      %c0_37 = arith.constant 0 : index
      %78 = vector.load %arg8[%c0_36, %c0_37] : memref<32x2xf32, #tpu.memory_space<vmem>>, vector<32x2xf32>
      %cst_38 = arith.constant dense<0.000000e+00> : vector<32x16xf32>
      %79 = tpu.matmul %78, %64, %cst_38 {dimension_numbers = #tpu.dot_dimension_numbers<[1], [0], [0], [1], [0, 0, 1, 1], [], []>} : vector<32x2xf32>, vector<2x16xf32>, vector<32x16xf32> -> vector<32x16xf32>
      %c0_39 = arith.constant 0 : index
      %c0_40 = arith.constant 0 : index
      %80 = vector.load %arg9[%c0_39, %c0_40] : memref<32x1xf32, #tpu.memory_space<vmem>>, vector<32x1xf32>
      %81 = vector.broadcast %80 : vector<32x1xf32> to vector<32x16xf32>
      %82 = arith.addf %79, %81 : vector<32x16xf32>
      %83 = arith.negf %82 : vector<32x16xf32>
      %84 = math.exp %83 : vector<32x16xf32>
      %cst_41 = arith.constant 1.000000e+00 : f32
      %85 = vector.broadcast %cst_41 : f32 to vector<32x16xf32>
      %86 = arith.addf %85, %84 : vector<32x16xf32>
      %87 = arith.divf %85, %86 : vector<32x16xf32>
      %c0_42 = arith.constant 0 : index
      %c0_43 = arith.constant 0 : index
      %c0_44 = arith.constant 0 : index
      %88 = vector.load %arg11[%c0_42, %c0_43, %c0_44] : memref<1x32x16xf32, #tpu.memory_space<vmem>>, vector<1x32x16xf32>
      %89 = vector.shape_cast %88 : vector<1x32x16xf32> to vector<32x16xf32>
      %90 = vector.shape_cast %87 : vector<32x16xf32> to vector<1x32x16xf32>
      tpu.vector_store %arg11[%c0_42, %c0_43, %c0_44], %90 {strides = array<i32>} : memref<1x32x16xf32, #tpu.memory_space<vmem>>, vector<1x32x16xf32>,
    } else {
    }
    return
  }
  func.func @transform_0(%arg0: i32, %arg1: i32) -> (i32, i32, i32) {
    %c0_i32 = arith.constant 0 : i32
    %c0_i32_0 = arith.constant 0 : i32
    return %arg0, %c0_i32, %arg1 : i32, i32, i32
  }
  func.func @transform_1(%arg0: i32, %arg1: i32) -> (i32, i32) {
    %c0_i32 = arith.constant 0 : i32
    %c0_i32_0 = arith.constant 0 : i32
    %c0_i32_1 = arith.constant 0 : i32
    return %c0_i32, %c0_i32_0 : i32, i32
  }
  func.func @transform_2(%arg0: i32, %arg1: i32) -> (i32, i32) {
    %c0_i32 = arith.constant 0 : i32
    %c0_i32_0 = arith.constant 0 : i32
    %c0_i32_1 = arith.constant 0 : i32
    return %c0_i32, %c0_i32_0 : i32, i32
  }
  func.func @transform_3(%arg0: i32, %arg1: i32) -> (i32, i32) {
    %c0_i32 = arith.constant 0 : i32
    %c0_i32_0 = arith.constant 0 : i32
    %c0_i32_1 = arith.constant 0 : i32
    return %c0_i32, %c0_i32_0 : i32, i32
  }
  func.func @transform_4(%arg0: i32, %arg1: i32) -> (i32, i32) {
    %c0_i32 = arith.constant 0 : i32
    %c0_i32_0 = arith.constant 0 : i32
    %c0_i32_1 = arith.constant 0 : i32
    return %c0_i32, %c0_i32_0 : i32, i32
  }
  func.func @transform_5(%arg0: i32, %arg1: i32) -> (i32, i32) {
    %c0_i32 = arith.constant 0 : i32
    %c0_i32_0 = arith.constant 0 : i32
    %c0_i32_1 = arith.constant 0 : i32
    return %c0_i32, %c0_i32_0 : i32, i32
  }
  func.func @transform_6(%arg0: i32, %arg1: i32) -> (i32, i32) {
    %c0_i32 = arith.constant 0 : i32
    %c0_i32_0 = arith.constant 0 : i32
    %c0_i32_1 = arith.constant 0 : i32
    return %c0_i32, %c0_i32_0 : i32, i32
  }
  func.func @transform_7(%arg0: i32, %arg1: i32) -> (i32, i32) {
    %c0_i32 = arith.constant 0 : i32
    %c0_i32_0 = arith.constant 0 : i32
    %c0_i32_1 = arith.constant 0 : i32
    return %c0_i32, %c0_i32_0 : i32, i32
  }
  func.func @transform_8(%arg0: i32, %arg1: i32) -> (i32, i32, i32) {
    %c0_i32 = arith.constant 0 : i32
    %c0_i32_0 = arith.constant 0 : i32
    %c0_i32_1 = arith.constant 0 : i32
    return %arg0, %c0_i32, %c0_i32_0 : i32, i32, i32
  }
  func.func @transform_9(%arg0: i32, %arg1: i32) -> (i32, i32, i32) {
    %c0_i32 = arith.constant 0 : i32
    %c0_i32_0 = arith.constant 0 : i32
    %c0_i32_1 = arith.constant 0 : i32
    return %arg0, %c0_i32, %c0_i32_0 : i32, i32, i32
  }
}

</mosaic_0001>

<bundles_post_ra>
// kernel: tpu_custom_call.1
= control target key start
LH: loop header
LB: loop body
LE: loop exit
PB: predicated region body
PF: predicated region fallthrough
CT: control target
= control target key end

     0   :  { %s1685_s30 = smov 0   ;;  %s1687_s10 = smov 0   ;;  %s2073_s0 = inlined_call_operand.vmem [shape: f32[2,32,256], index: 0, kind: input, shape index: {}]   ;;  %s2074_s1 = inlined_call_operand.vmem [shape: f32[256,16], index: 1, kind: input, shape index: {}]   ;;  %s2075_s2 = inlined_call_operand.vmem [shape: f32[2,32], index: 2, kind: input, shape index: {}]   ;;  %s2076_s3 = inlined_call_operand.vmem [shape: f32[2,1], index: 3, kind: input, shape index: {}]   ;;  %s2077_s4 = inlined_call_operand.vmem [shape: f32[32,2], index: 4, kind: input, shape index: {}]   ;;  %s2078_s5 = inlined_call_operand.vmem [shape: f32[32,1], index: 5, kind: input, shape index: {}]   ;;  %s2079_s6 = inlined_call_operand.vmem [shape: f32[32,2], index: 6, kind: input, shape index: {}]   ;;  %s2080_s7 = inlined_call_operand.vmem [shape: f32[32,1], index: 7, kind: input, shape index: {}]   ;;  %s2081_s8 = inlined_call_operand.vmem [shape: f32[2,32,16], index: 8, kind: output, shape index: {0}]   ;;  %s2082_s9 = inlined_call_operand.vmem [shape: f32[2,32,16], index: 9, kind: output, shape index: {1}]  }
   0x1   :  { %s1689_s11 = smov 0  }
   0x2 LB: > { %s32_s12 = sadd.s32 1, %s1618_s10  ;;  %p1353_p0 = scmp.ge.s32.totalorder %s1622_s11, 1  ;;  %s1622_s11 = sphi %s1689_s11, %s20_s11   ;;  %s1618_s10 = sphi %s1687_s10, %s2084_s10   ;;  %s1614_s30 = sphi %s1685_s30, %s2083_s30  }
   0x3   : > { %p34_p1 = scmp.ge.s32.totalorder %s32_s12, 2  ;;  %p309_p2 = scmp.lt.s32.totalorder %s1622_s11, 3 }
   0x5   : > { %s2086_s12 = smov (%p34_p1, %s32_s12), 0  ;;  %p310_p3 = pnand %p1353_p0, %p309_p2 }
   0x6   : > { %v634_v0 = vld [vmem:[%s2074_s1 + $0x80] sm:$0xff] (!%p310_p3)  ;;  %v635_v1 = vld [vmem:[%s2074_s1 + $0x88] sm:$0xff] (!%p310_p3)  ;;  %p355_p4 = scmp.lt.s32.totalorder (!%p310_p3), %s1614_s30, 1  ;;  %v636_v5 = vld [vmem:[%s2074_s1 + $0x90] sm:$0xff] (!%p310_p3)  ;;  %s1624_s28 = smov (!%p310_p3), 96   ;;  %vm739_vm0 = vcmask (!%p310_p3), 130048  }
   0x7   : > { %313 = sbr.rel (%p310_p3) target bundleno = 757 (0x2f5), region = 52  ;;  %v618_v2 = vld [vmem:[%s2074_s1] sm:$0xff] (!%p310_p3)  ;;  %v1487_v3 = vpack.c.bf16 (!%p310_p3), %v635_v1, %v634_v0  ;;  %v619_v4 = vld [vmem:[%s2074_s1 + $0x8] sm:$0xff] (!%p310_p3)  ;;  %v637_v6 = vld [vmem:[%s2074_s1 + $0x98] sm:$0xff] (!%p310_p3)  ;;  %s1625_s29 = smov (!%p310_p3), 112   ;;  %v1631_v56 = vmov (!%p310_p3), 0.0  }
   0x8   : > { %v1489_v7 = vpack.c.bf16 (!%p310_p3), %v619_v4, %v618_v2  ;;  %v1491_v8 = vpack.c.bf16 (!%p310_p3), %v637_v6, %v636_v5  ;;  %v620_v9 = vld [vmem:[%s2074_s1 + $0x10] sm:$0xff] (!%p310_p3)  ;;  %v621_v10 = vld [vmem:[%s2074_s1 + $0x18] sm:$0xff] (!%p310_p3)  ;;  %v638_v11 = vld [vmem:[%s2074_s1 + $0xa0] sm:$0xff] (!%p310_p3)  ;;  %s1626_s24 = smov (!%p310_p3), 80   ;;  %s1627_s23 = smov (!%p310_p3), 64   ;;  %741 = vst.msk [vmem:[#allocation3 + $0x8] sm:$0xff] (!%p310_p3), %vm739_vm0, %v1631_v56 }
   0x9   : > { %1488 = vmatprep.subr.bf16.mxu0 (!%p310_p3), %v1487_v3  ;;  %v639_v12 = vld [vmem:[%s2074_s1 + $0xa8] sm:$0xff] (!%p310_p3)  ;;  %v1493_v13 = vpack.c.bf16 (!%p310_p3), %v621_v10, %v620_v9  ;;  %v622_v15 = vld [vmem:[%s2074_s1 + $0x20] sm:$0xff] (!%p310_p3)  ;;  %v640_v18 = vld [vmem:[%s2074_s1 + $0xb0] sm:$0xff] (!%p310_p3)  ;;  %s1628_s25 = smov (!%p310_p3), 48   ;;  %s1629_s26 = smov (!%p310_p3), 32   ;;  %740 = vst.msk [vmem:[#allocation3] sm:$0xff] (!%p310_p3), %vm739_vm0, %v1631_v56 }
   0xa   : > { %1490 = vmatpush3.bf16.msra.mxu0 (!%p310_p3), %v1489_v7  ;;  %v1495_v14 = vpack.c.bf16 (!%p310_p3), %v639_v12, %v638_v11  ;;  %v623_v16 = vld [vmem:[%s2074_s1 + $0x28] sm:$0xff] (!%p310_p3)  ;;  %v641_v19 = vld [vmem:[%s2074_s1 + $0xb8] sm:$0xff] (!%p310_p3)  ;;  %v624_v23 = vld [vmem:[%s2074_s1 + $0x30] sm:$0xff] (!%p310_p3)  ;;  %742 = vst.msk [vmem:[#allocation3 + $0x10] sm:$0xff] (!%p310_p3), %vm739_vm0, %v1631_v56  ;;  %v1632_v9 = vmov (!%p310_p3), 0.0|0.0   ;;  %vm1633_vm1 = vmmov (!%p310_p3), 0  }
   0xb   : > { %1492 = vmatprep.subr.bf16.mxu0 (!%p310_p3), %v1491_v8  ;;  %v1497_v21 = vpack.c.bf16 (!%p310_p3), %v623_v16, %v622_v15  ;;  %v1499_v22 = vpack.c.bf16 (!%p310_p3), %v641_v19, %v640_v18  ;;  %v625_v24 = vld [vmem:[%s2074_s1 + $0x38] sm:$0xff] (!%p310_p3)  ;;  %v642_v25 = vld [vmem:[%s2074_s1 + $0xc0] sm:$0xff] (!%p310_p3)  ;;  %v643_v26 = vld [vmem:[%s2074_s1 + $0xc8] sm:$0xff] (!%p310_p3)  ;;  %743 = vst.msk [vmem:[#allocation3 + $0x18] sm:$0xff] (!%p310_p3), %vm739_vm0, %v1631_v56  ;;  %1519 = vmatprep.subr.bf16.mxu1 (!%p310_p3), %v1632_v9  ;;  %vm785_vm2 = vcmask (!%p310_p3), 261120   ;;  %vm959_vm3 = vcmask (!%p310_p3), 15360  }
   0xc   : > { %v1501_v29 = vpack.c.bf16 (!%p310_p3), %v625_v24, %v624_v23  ;;  %v1503_v31 = vpack.c.bf16 (!%p310_p3), %v643_v26, %v642_v25  ;;  %v626_v32 = vld [vmem:[%s2074_s1 + $0x40] sm:$0xff] (!%p310_p3)  ;;  %v627_v33 = vld [vmem:[%s2074_s1 + $0x48] sm:$0xff] (!%p310_p3)  ;;  %v644_v34 = vld [vmem:[%s2074_s1 + $0xd0] sm:$0xff] (!%p310_p3)  ;;  %1457 = vmatprep.mubr.msk.f32.mxu1 (!%p310_p3), %vm1633_vm1, %v1631_v56  ;;  %v1634_v25 = vmov (!%p310_p3), 0   ;;  %vm972_vm4 = vcmask (!%p310_p3), 1041408  }
   0xd   : > { %v645_v35 = vld [vmem:[%s2074_s1 + $0xd8] sm:$0xff] (!%p310_p3)  ;;  %v1505_v36 = vpack.c.bf16 (!%p310_p3), %v627_v33, %v626_v32  ;;  %v628_v38 = vld [vmem:[%s2074_s1 + $0x50] sm:$0xff] (!%p310_p3)  ;;  %v646_v40 = vld [vmem:[%s2074_s1 + $0xe0] sm:$0xff] (!%p310_p3)  ;;  %1566 = vset.pattern.permute.xlu0 (!%p310_p3), %v1634_v25  ;;  %1567 = vset.pattern.permute.xlu1 (!%p310_p3), %v1634_v25 }
   0xe   : > { %s2088_s30 = smov (!%p355_p4, %s1614_s30), 1  ;;  %1494 = vmatpush3.bf16.msra.mxu0 %v1493_v13  ;;  %v1507_v37 = vpack.c.bf16 %v645_v35, %v644_v34  ;;  %v629_v39 = vld [vmem:[%s2074_s1 + $0x58] sm:$0xff]  ;;  %v647_v41 = vld [vmem:[%s2074_s1 + $0xe8] sm:$0xff]  ;;  %v630_v44 = vld [vmem:[%s2074_s1 + $0x60] sm:$0xff] }
   0xf   : > { %s1382_s16 = sshll.u32 %s2088_s30, 6  ;;  %1496 = vmatprep.subr.bf16.mxu0 %v1495_v14  ;;  %v1509_v42 = vpack.c.bf16 %v629_v39, %v628_v38  ;;  %v1511_v43 = vpack.c.bf16 %v647_v41, %v646_v40  ;;  %v631_v45 = vld [vmem:[%s2074_s1 + $0x68] sm:$0xff]  ;;  %v648_v46 = vld [vmem:[%s2074_s1 + $0xf0] sm:$0xff]  ;;  %v649_v47 = vld [vmem:[%s2074_s1 + $0xf8] sm:$0xff] }
  0x10   : > { %s1739_s19 = scalar_lea.vmem %s2073_s0, %s1382_s16  ;;  %v1513_v48 = vpack.c.bf16 %v631_v45, %v630_v44  ;;  %v1515_v49 = vpack.c.bf16 %v649_v47, %v648_v46  ;;  %v632_v50 = vld [vmem:[%s2074_s1 + $0x70] sm:$0xff]  ;;  %v633_v51 = vld [vmem:[%s2074_s1 + $0x78] sm:$0xff] }
  0x11   : > { %v1748_v17 = vld [vmem:[%s1739_s19] sm:$0xff]  ;;  %v1761_v20 = vld [vmem:[%s1739_s19 + $0x10] sm:$0xff]  ;;  %v1786_v30 = vld [vmem:[%s1739_s19 + $0x8] sm:$0xff]  ;;  %v1517_v52 = vpack.c.bf16 %v633_v51, %v632_v50 }
  0x12   : > { %402 = vrot.lane.b32.xlu1 %v1748_v17, %s1624_s28  ;;  %386 = vrot.lane.b32.xlu0 %v1748_v17, %s1625_s29  ;;  %v1780_v27 = vld [vmem:[%s1739_s19 + $0x30] sm:$0xff]  ;;  %v1783_v28 = vld [vmem:[%s1739_s19 + $0x20] sm:$0xff] }
  0x13   : > { %1498 = vmatpush3.bf16.msra.mxu0 %v1497_v21  ;;  %714 = vmatprep.mubr.f32.mxu0 %v1786_v30  ;;  %v1852_v53 = vld [vmem:[%s1739_s19 + $0x18] sm:$0xff]  ;;  %v1861_v54 = vld [vmem:[%s1739_s19 + $0x28] sm:$0xff]  ;;  %v937_v26 = vld [vmem:[%s2078_s5 + $0x10] sm:$0xff] }
  0x14   : > { %1500 = vmatprep.subr.bf16.mxu0 %v1499_v22  ;;  %v1870_v55 = vld [vmem:[%s1739_s19 + $0x38] sm:$0xff]  ;;  %s1630_s19 = smov 16   ;;  %v779_v22 = vld [vmem:[%s2076_s3] sm:$0x3]  ;;  %v1095_v33 = vld [vmem:[%s2080_s7 + $0x10] sm:$0xff] }
  0x16   : > { %404 = vrot.lane.b32.xlu1 %v1761_v20, %s1624_s28  ;;  %388 = vrot.lane.b32.xlu0 %v1761_v20, %s1625_s29 }
  0x17   : > { %1502 = vmatpush3.bf16.msra.mxu0 %v1501_v29  ;;  %v1093_v29 = vld [vmem:[%s2080_s7] sm:$0xff] }
  0x18   : > { %1504 = vmatprep.subr.bf16.mxu0 %v1503_v31 }
  0x1a   : > { %392 = vrot.lane.b32.xlu1 %v1780_v27, %s1625_s29  ;;  %390 = vrot.lane.b32.xlu0 %v1783_v28, %s1625_s29 }
  0x1b   : > { %1506 = vmatpush3.bf16.msra.mxu0 %v1505_v36 }
  0x1c   : > { %1508 = vmatprep.subr.bf16.mxu0 %v1507_v37 }
  0x1e   : > { %420 = vrot.lane.b32.xlu1 %v1761_v20, %s1626_s24  ;;  %418 = vrot.lane.b32.xlu0 %v1748_v17, %s1626_s24 }
  0x1f   : > { %1510 = vmatpush3.bf16.msra.mxu0 %v1509_v42 }
  0x20   : > { %1512 = vmatprep.subr.bf16.mxu0 %v1511_v43 }
  0x22   : > { %408 = vrot.lane.b32.xlu1 %v1780_v27, %s1624_s28  ;;  %406 = vrot.lane.b32.xlu0 %v1783_v28, %s1624_s28 }
  0x23   : > { %1514 = vmatpush3.bf16.msra.mxu0 %v1513_v48 }
  0x24   : > { %1516 = vmatprep.subr.bf16.mxu0 %v1515_v49 }
  0x26   : > { %436 = vrot.lane.b32.xlu1 %v1761_v20, %s1627_s23  ;;  %434 = vrot.lane.b32.xlu0 %v1748_v17, %s1627_s23 }
  0x27   : > { %1518 = vmatpush3.bf16.msra.mxu0 %v1517_v52 }
  0x2a   : > { %424 = vrot.lane.b32.xlu1 %v1780_v27, %s1626_s24  ;;  %422 = vrot.lane.b32.xlu0 %v1783_v28, %s1626_s24 }
  0x2b   : > { %715 = vmatmul.mubr.f32.vlgmr.msra.gmra.mrb[0].mxu0 %v1748_v17 }
  0x2c   : > { %719 = vmatprep.mubr.f32.mxu0 %v1852_v53 }
  0x2e   : > { %452 = vrot.lane.b32.xlu1 %v1761_v20, %s1628_s25  ;;  %450 = vrot.lane.b32.xlu0 %v1748_v17, %s1628_s25 }
  0x2f   : > { %720 = vmatmul.mubr.f32.gmra.mrb[2].mxu0 %v1761_v20 }
  0x30   : > { %724 = vmatprep.mubr.f32.mxu0 %v1861_v54 }
  0x32   : > { %440 = vrot.lane.b32.xlu1 %v1780_v27, %s1627_s23  ;;  %438 = vrot.lane.b32.xlu0 %v1783_v28, %s1627_s23 }
  0x33   : > { %725 = vmatmul.mubr.f32.gmra.mrb[4].mxu0 %v1783_v28 }
  0x34   : > { %729 = vmatprep.mubr.f32.mxu0 %v1870_v55 }
  0x36   : > { %468 = vrot.lane.b32.xlu1 %v1761_v20, %s1629_s26  ;;  %466 = vrot.lane.b32.xlu0 %v1748_v17, %s1629_s26 }
  0x37   : > { %730 = vmatmul.mubr.f32.gmra.mrb[6].mxu0 %v1780_v27 }
  0x3a   : > { %456 = vrot.lane.b32.xlu1 %v1780_v27, %s1628_s25  ;;  %454 = vrot.lane.b32.xlu0 %v1783_v28, %s1628_s25 }
  0x3e   : > { %484 = vrot.lane.b32.xlu1 %v1761_v20, %s1630_s19  ;;  %482 = vrot.lane.b32.xlu0 %v1748_v17, %s1630_s19 }
  0x42   : > { %472 = vrot.lane.b32.xlu1 %v1780_v27, %s1629_s26  ;;  %470 = vrot.lane.b32.xlu0 %v1783_v28, %s1629_s26 }
  0x46   : > { %488 = vrot.lane.b32.xlu1 %v1780_v27, %s1630_s19  ;;  %486 = vrot.lane.b32.xlu0 %v1783_v28, %s1630_s19 }
  0x4a   : > { %508 = vrot.lane.b32.xlu1 %v1852_v53, %s1625_s29  ;;  %506 = vrot.lane.b32.xlu0 %v1786_v30, %s1625_s29 }
  0x4e   : > { %524 = vrot.lane.b32.xlu1 %v1852_v53, %s1624_s28  ;;  %522 = vrot.lane.b32.xlu0 %v1786_v30, %s1624_s28 }
  0x52   : > { %512 = vrot.lane.b32.xlu1 %v1870_v55, %s1625_s29  ;;  %510 = vrot.lane.b32.xlu0 %v1861_v54, %s1625_s29 }
  0x56   : > { %540 = vrot.lane.b32.xlu1 %v1852_v53, %s1626_s24  ;;  %538 = vrot.lane.b32.xlu0 %v1786_v30, %s1626_s24 }
  0x5a   : > { %528 = vrot.lane.b32.xlu1 %v1870_v55, %s1624_s28  ;;  %526 = vrot.lane.b32.xlu0 %v1861_v54, %s1624_s28 }
  0x5e   : > { %556 = vrot.lane.b32.xlu1 %v1852_v53, %s1627_s23  ;;  %554 = vrot.lane.b32.xlu0 %v1786_v30, %s1627_s23 }
  0x62   : > { %544 = vrot.lane.b32.xlu1 %v1870_v55, %s1626_s24  ;;  %542 = vrot.lane.b32.xlu0 %v1861_v54, %s1626_s24  ;;  %s1383_s24 = sshll.u32 %s2088_s30, 5 }
  0x63   : > { %s368_s14 = scalar_lea.vmem %s2081_s8, %s1383_s24  ;;  %s373_s16 = scalar_lea.vmem %s2082_s9, %s1383_s24 }
  0x66   : > { %572 = vrot.lane.b32.xlu1 %v1852_v53, %s1628_s25  ;;  %570 = vrot.lane.b32.xlu0 %v1786_v30, %s1628_s25 }
  0x6a   : > { %560 = vrot.lane.b32.xlu1 %v1870_v55, %s1627_s23  ;;  %558 = vrot.lane.b32.xlu0 %v1861_v54, %s1627_s23 }
  0x6e   : > { %588 = vrot.lane.b32.xlu1 %v1852_v53, %s1629_s26  ;;  %586 = vrot.lane.b32.xlu0 %v1786_v30, %s1629_s26 }
  0x72   : > { %576 = vrot.lane.b32.xlu1 %v1870_v55, %s1628_s25  ;;  %574 = vrot.lane.b32.xlu0 %v1861_v54, %s1628_s25 }
  0x76   : > { %604 = vrot.lane.b32.xlu1 %v1852_v53, %s1630_s19  ;;  %602 = vrot.lane.b32.xlu0 %v1786_v30, %s1630_s19 }
  0x7a   : > { %592 = vrot.lane.b32.xlu1 %v1870_v55, %s1629_s26  ;;  %590 = vrot.lane.b32.xlu0 %v1861_v54, %s1629_s26 }
  0x7e   : > { %608 = vrot.lane.b32.xlu1 %v1870_v55, %s1630_s19  ;;  %606 = vrot.lane.b32.xlu0 %v1861_v54, %s1630_s19 }
  0x82   : > { %782 = vperm.xlu0 %1566, %v779_v22  }
  0x84   : > { %v403_v57 = vpop.permute.xlu1 %402  ;;  %v387_v58 = vpop.permute.xlu0 %386 }
  0x85   : > { %v398_v59 = vadd.f32 %v387_v58, %v1748_v17 }
  0x86   : > { %951 = vperm.xlu0 %1566, %v937_v26  }
  0x87   : > { %v414_v60 = vadd.f32 %v403_v57, %v398_v59 }
  0x88   : > { %v405_v61 = vpop.permute.xlu1 %404  ;;  %v389_v62 = vpop.permute.xlu0 %388 }
  0x89   : > { %v399_v63 = vadd.f32 %v389_v62, %v1761_v20 }
  0x8a   : > { %1099 = vperm.xlu0 %1566, %v1093_v29  }
  0x8b   : > { %v415_v0 = vadd.f32 %v405_v61, %v399_v63 }
  0x8c   : > { %v393_v1 = vpop.permute.xlu1 %392  ;;  %v391_v2 = vpop.permute.xlu0 %390 }
  0x8d   : > { %v401_v5 = vadd.f32 %v393_v1, %v1780_v27  ;;  %v400_v6 = vadd.f32 %v391_v2, %v1783_v28 }
  0x8e   : > { %1109 = vperm.xlu0 %1566, %v1095_v33  }
  0x90   : > { %v421_v3 = vpop.permute.xlu1 %420  ;;  %v419_v4 = vpop.permute.xlu0 %418 }
  0x91   : > { %v431_v7 = vadd.f32 %v421_v3, %v415_v0  ;;  %v430_v8 = vadd.f32 %v419_v4, %v414_v60 }
  0x94   : > { %v409_v10 = vpop.permute.xlu1 %408  ;;  %v407_v11 = vpop.permute.xlu0 %406 }
  0x95   : > { %v417_v12 = vadd.f32 %v409_v10, %v401_v5  ;;  %v416_v13 = vadd.f32 %v407_v11, %v400_v6 }
  0x98   : > { %v437_v14 = vpop.permute.xlu1 %436  ;;  %v435_v15 = vpop.permute.xlu0 %434 }
  0x99   : > { %v447_v46 = vadd.f32 %v437_v14, %v431_v7  ;;  %v446_v47 = vadd.f32 %v435_v15, %v430_v8 }
  0x9c   : > { %v425_v16 = vpop.permute.xlu1 %424  ;;  %v423_v17 = vpop.permute.xlu0 %422 }
  0x9d   : > { %v433_v50 = vadd.f32 %v425_v16, %v417_v12  ;;  %v432_v51 = vadd.f32 %v423_v17, %v416_v13 }
  0xa0   : > { %v453_v18 = vpop.permute.xlu1 %452  ;;  %v451_v19 = vpop.permute.xlu0 %450 }
  0xa1   : > { %v463_v52 = vadd.f32 %v453_v18, %v447_v46  ;;  %v462_v57 = vadd.f32 %v451_v19, %v446_v47 }
  0xa4   : > { %v441_v20 = vpop.permute.xlu1 %440  ;;  %v439_v21 = vpop.permute.xlu0 %438 }
  0xa5   : > { %v449_v60 = vadd.f32 %v441_v20, %v433_v50  ;;  %v448_v61 = vadd.f32 %v439_v21, %v432_v51 }
  0xa8   : > { %v469_v23 = vpop.permute.xlu1 %468  ;;  %v467_v24 = vpop.permute.xlu0 %466 }
  0xa9   : > { %v479_v62 = vadd.f32 %v469_v23, %v463_v52  ;;  %v478_v63 = vadd.f32 %v467_v24, %v462_v57 }
  0xac   : > { %v457_v27 = vpop.permute.xlu1 %456  ;;  %v455_v28 = vpop.permute.xlu0 %454 }
  0xad   : > { %v465_v2 = vadd.f32 %v457_v27, %v449_v60  ;;  %v464_v3 = vadd.f32 %v455_v28, %v448_v61  ;;  %v746_v60 = vld [vmem:[#allocation3 + $0x10] sm:$0xff] }
  0xb0   : > { %v485_v31 = vpop.permute.xlu1 %484  ;;  %v483_v32 = vpop.permute.xlu0 %482 }
  0xb1   : > { %v495_v4 = vadd.f32 %v485_v31, %v479_v62  ;;  %v494_v5 = vadd.f32 %v483_v32, %v478_v63 }
  0xb3   : > { %v499_v11 = vadd.f32 %v495_v4, %v1852_v53  ;;  %v498_v12 = vadd.f32 %v494_v5, %v1786_v30 }
  0xb4   : > { %v473_v34 = vpop.permute.xlu1 %472  ;;  %v471_v35 = vpop.permute.xlu0 %470 }
  0xb5   : > { %v481_v8 = vadd.f32 %v473_v34, %v465_v2  ;;  %v480_v10 = vadd.f32 %v471_v35, %v464_v3 }
  0xb8   : > { %v489_v36 = vpop.permute.xlu1 %488  ;;  %v487_v37 = vpop.permute.xlu0 %486 }
  0xb9   : > { %v497_v17 = vadd.f32 %v489_v36, %v481_v8  ;;  %v496_v18 = vadd.f32 %v487_v37, %v480_v10 }
  0xbb   : > { %v501_v25 = vadd.f32 %v497_v17, %v1870_v55  ;;  %v500_v26 = vadd.f32 %v496_v18, %v1861_v54 }
  0xbc   : > { %v509_v38 = vpop.permute.xlu1 %508  ;;  %v507_v39 = vpop.permute.xlu0 %506 }
  0xbd   : > { %v519_v15 = vadd.f32 %v509_v38, %v499_v11  ;;  %v518_v16 = vadd.f32 %v507_v39, %v498_v12  ;;  %v745_v38 = vld [vmem:[#allocation3 + $0x8] sm:$0xff] }
  0xc0   : > { %v525_v40 = vpop.permute.xlu1 %524  ;;  %v523_v41 = vpop.permute.xlu0 %522 }
  0xc1   : > { %v535_v19 = vadd.f32 %v525_v40, %v519_v15  ;;  %v534_v20 = vadd.f32 %v523_v41, %v518_v16  ;;  %v744_v40 = vld [vmem:[#allocation3] sm:$0xff] }
  0xc4   : > { %v513_v42 = vpop.permute.xlu1 %512  ;;  %v511_v43 = vpop.permute.xlu0 %510 }
  0xc5   : > { %v521_v29 = vadd.f32 %v513_v42, %v501_v25  ;;  %v520_v31 = vadd.f32 %v511_v43, %v500_v26 }
  0xc8   : > { %v541_v44 = vpop.permute.xlu1 %540  ;;  %v539_v45 = vpop.permute.xlu0 %538 }
  0xc9   : > { %v551_v23 = vadd.f32 %v541_v44, %v535_v19  ;;  %v550_v24 = vadd.f32 %v539_v45, %v534_v20 }
  0xcc   : > { %v529_v48 = vpop.permute.xlu1 %528  ;;  %v527_v49 = vpop.permute.xlu0 %526 }
  0xcd   : > { %v537_v34 = vadd.f32 %v529_v48, %v521_v29  ;;  %v536_v35 = vadd.f32 %v527_v49, %v520_v31  ;;  %v931_v31 = vld [vmem:[%s2077_s4] sm:$0xff] }
  0xd0   : > { %v557_v58 = vpop.permute.xlu1 %556  ;;  %v555_v59 = vpop.permute.xlu0 %554 }
  0xd1   : > { %v567_v27 = vadd.f32 %v557_v58, %v551_v23  ;;  %v566_v53 = vadd.f32 %v555_v59, %v550_v24  ;;  %v747_v58 = vld [vmem:[#allocation3 + $0x18] sm:$0xff] }
  0xd4   : > { %v545_v0 = vpop.permute.xlu1 %544  ;;  %v543_v1 = vpop.permute.xlu0 %542 }
  0xd5   : > { %v553_v44 = vadd.f32 %v545_v0, %v537_v34  ;;  %v552_v55 = vadd.f32 %v543_v1, %v536_v35  ;;  %v1096_v34 = vld [vmem:[%s2080_s7 + $0x18] sm:$0xff] }
  0xd8   : > { %v573_v6 = vpop.permute.xlu1 %572  ;;  %v571_v7 = vpop.permute.xlu0 %570 }
  0xd9   : > { %v583_v32 = vadd.f32 %v573_v6, %v567_v27  ;;  %v582_v33 = vadd.f32 %v571_v7, %v566_v53  ;;  %v778_v27 = vld [vmem:[%s2075_s2] sm:$0x3] }
  0xdc   : > { %v561_v13 = vpop.permute.xlu1 %560  ;;  %v559_v14 = vpop.permute.xlu0 %558 }
  0xdd   : > { %v569_v46 = vadd.f32 %v561_v13, %v553_v44  ;;  %v568_v47 = vadd.f32 %v559_v14, %v552_v55  ;;  %v934_v55 = vld [vmem:[%s2077_s4 + $0x18] sm:$0xff] }
  0xe0   : > { %v589_v21 = vpop.permute.xlu1 %588  ;;  %v587_v22 = vpop.permute.xlu0 %586 }
  0xe1   : > { %v599_v36 = vadd.f32 %v589_v21, %v583_v32  ;;  %v598_v37 = vadd.f32 %v587_v22, %v582_v33  ;;  %v935_v32 = vld [vmem:[%s2078_s5] sm:$0xff]  ;;  %v1094_v33 = vld [vmem:[%s2080_s7 + $0x8] sm:$0xff] }
  0xe2   : > { %941 = vperm.xlu1 %1567, %v935_v32  }
  0xe4   : > { %v577_v28 = vpop.permute.xlu1 %576  ;;  %v575_v30 = vpop.permute.xlu0 %574 }
  0xe5   : > { %v585_v52 = vadd.f32 %v577_v28, %v569_v46  ;;  %v584_v57 = vadd.f32 %v575_v30, %v568_v47  ;;  %v1089_v46 = vld [vmem:[%s2079_s6] sm:$0xff] }
  0xe8   : > { %v605_v39 = vpop.permute.xlu1 %604  ;;  %v603_v41 = vpop.permute.xlu0 %602 }
  0xe9   : > { %v615_v45 = vadd.f32 %v605_v39, %v599_v36  ;;  %v614_v54 = vadd.f32 %v603_v41, %v598_v37  ;;  %v933_v41 = vld [vmem:[%s2077_s4 + $0x10] sm:$0xff] }
  0xeb   : > { %v749_v50 = vadd.f32 %v745_v38, %v615_v45  ;;  %v748_v51 = vadd.f32 %v744_v40, %v614_v54  ;;  %v932_v40 = vld [vmem:[%s2077_s4 + $0x8] sm:$0xff] }
  0xec   : > { %v593_v42 = vpop.permute.xlu1 %592  ;;  %v591_v43 = vpop.permute.xlu0 %590 }
  0xed   : > { %754 = vst.msk [vmem:[#allocation3 + $0x8] sm:$0xff] %vm739_vm0, %v749_v50  ;;  %753 = vst.msk [vmem:[#allocation3] sm:$0xff] %vm739_vm0, %v748_v51  ;;  %v601_v48 = vadd.f32 %v593_v42, %v585_v52  ;;  %v600_v49 = vadd.f32 %v591_v43, %v584_v57  ;;  %v1090_v50 = vld [vmem:[%s2079_s6 + $0x8] sm:$0xff]  ;;  %v1091_v51 = vld [vmem:[%s2079_s6 + $0x10] sm:$0xff] }
  0xee   : > { %v1092_v42 = vld [vmem:[%s2079_s6 + $0x18] sm:$0xff] }
  0xf0   : > { %v609_v59 = vpop.permute.xlu1 %608  ;;  %v607_v61 = vpop.permute.xlu0 %606 }
  0xf1   : > { %v617_v62 = vadd.f32 %v609_v59, %v601_v48  ;;  %v616_v63 = vadd.f32 %v607_v61, %v600_v49 }
  0xf3   : > { %v751_v0 = vadd.f32 %v747_v58, %v617_v62  ;;  %v750_v1 = vadd.f32 %v746_v60, %v616_v63 }
  0xf4   : > { %v770_v18 = vld [vmem:[#allocation3] sm:$0xff]  ;;  %v771_v19 = vld [vmem:[#allocation3 + $0x8] sm:$0xff] }
  0xf5   : > { %756 = vst.msk [vmem:[#allocation3 + $0x18] sm:$0xff] %vm739_vm0, %v751_v0  ;;  %755 = vst.msk [vmem:[#allocation3 + $0x10] sm:$0xff] %vm739_vm0, %v750_v1  ;;  %v774_v23 = vmul.f32 0.0625, %v770_v18  ;;  %v775_v24 = vmul.f32 0.0625, %v771_v19 }
  0xf7   : > { %v1526_v53 = vpack.c.bf16 %v775_v24, %v774_v23 }
  0xfc   : > { %v772_v25 = vld [vmem:[#allocation3 + $0x10] sm:$0xff]  ;;  %v773_v26 = vld [vmem:[#allocation3 + $0x18] sm:$0xff] }
  0xfd   : > { %v776_v28 = vmul.f32 0.0625, %v772_v25  ;;  %v777_v30 = vmul.f32 0.0625, %v773_v26 }
  0xfe   : > { %v1417_v2 = vpop.f32.mrb[0].mxu0 }
  0xff   : > { %v1418_v3 = vpop.f32.mrb[1].mxu0  ;;  %v1529_v29 = vpack.c.bf16 %v777_v30, %v776_v28 }
 0x100   : > { %v1419_v4 = vadd.f32 %v1418_v3, %v1417_v2 }
 0x101   : > { %v783_v35 = vpop.permute.xlu0 %782 }
 0x102   : > { %759 = vst.msk [vmem:[#allocation2] sm:$0xff] %vm739_vm0, %v1419_v4  ;;  %v1420_v5 = vpop.f32.mrb[2].mxu0 }
 0x103   : > { %v1421_v6 = vpop.f32.mrb[3].mxu0 }
 0x104   : > { %v1422_v7 = vadd.f32 %v1421_v6, %v1420_v5 }
 0x105   : > { %v952_v49 = vpop.permute.xlu0 %951 }
 0x106   : > { %760 = vst.msk [vmem:[#allocation2 + $0x8] sm:$0xff] %vm739_vm0, %v1422_v7  ;;  %v1423_v8 = vpop.f32.mrb[4].mxu0 }
 0x107   : > { %v1424_v10 = vpop.f32.mrb[5].mxu0 }
 0x108   : > { %v1425_v11 = vadd.f32 %v1424_v10, %v1423_v8 }
 0x109   : > { %v766_v15 = vld [vmem:[#allocation2] sm:$0xff]  ;;  %v1100_v4 = vpop.permute.xlu0 %1099 }
 0x10a   : > { %761 = vst.msk [vmem:[#allocation2 + $0x10] sm:$0xff] %vm739_vm0, %v1425_v11  ;;  %v1426_v12 = vpop.f32.mrb[6].mxu0 }
 0x10b   : > { %v1427_v13 = vpop.f32.mrb[7].mxu0 }
 0x10c   : > { %v1428_v14 = vadd.f32 %v1427_v13, %v1426_v12 }
 0x10d   : > { %v767_v16 = vld [vmem:[#allocation2 + $0x8] sm:$0xff] }
 0x10e   : > { %762 = vst.msk [vmem:[#allocation2 + $0x18] sm:$0xff] %vm739_vm0, %v1428_v14  ;;  %v1520_v17 = vpack.c.bf16 %v767_v16, %v766_v15  ;;  %v1110_v16 = vpop.permute.xlu0 %1109 }
 0x110   : > { %1521 = vmatpush3.bf16.msra.mxu1 %v1520_v17 }
 0x111   : > { %1522 = vmatprep.subr.bf16.mxu1 %v1632_v9  ;;  %v768_v20 = vld [vmem:[#allocation2 + $0x10] sm:$0xff] }
 0x115   : > { %v769_v21 = vld [vmem:[#allocation2 + $0x18] sm:$0xff] }
 0x116   : > { %v1523_v22 = vpack.c.bf16 %v769_v21, %v768_v20 }
 0x118   : > { %1524 = vmatpush3.bf16.msra.mxu1 %v1523_v22 }
 0x119   : > { %1525 = vmatprep.subr.bf16.mxu1 %v1632_v9 }
 0x11b   : > { %1458 = vmatmul.mubr.msk.f32.vlgmr.msra.gmra.mrb[0].mxu1 %vm785_vm2, %v778_v27 }
 0x11c   : > { %1527 = vmatpush3.bf16.msra.mxu1 %v1526_v53  ;;  %1468 = vmatprep.mubr.msk.f32.mxu1 %vm1633_vm1, %v1631_v56  ;;  %v936_v56 = vld [vmem:[%s2078_s5 + $0x8] sm:$0xff] }
 0x11d   : > { %1528 = vmatprep.subr.bf16.mxu1 %v1632_v9  ;;  %946 = vperm.xlu1 %1567, %v936_v56   ;;  %v938_v9 = vld [vmem:[%s2078_s5 + $0x18] sm:$0xff] }
 0x120   : > { %1530 = vmatpush3.bf16.msra.mxu1 %v1529_v29 }
 0x121   : > { %956 = vperm.xlu1 %1567, %v938_v9  }
 0x123   : > { %1469 = vmatmul.mubr.msk.f32.vlgmr.msra.gmra.mrb[2].mxu1 %vm785_vm2, %v778_v27 }
 0x124   : > { %1473 = vmatprep.mubr.msk.f32.mxu1 %vm959_vm3, %v931_v31 }
 0x125   : > { %1104 = vperm.xlu1 %1567, %v1094_v33  }
 0x129   : > { %1114 = vperm.xlu1 %1567, %v1096_v34  }
 0x161   : > { %v942_v43 = vpop.permute.xlu1 %941 }
 0x19c   : > { %v947_v52 = vpop.permute.xlu1 %946 }
 0x1a0   : > { %v957_v57 = vpop.permute.xlu1 %956 }
 0x1a4   : > { %v1105_v2 = vpop.permute.xlu1 %1104 }
 0x1a8   : > { %v1115_v13 = vpop.permute.xlu1 %1114 }
 0x1ee   : > { %v855_v36 = vpop.f32.mrb[0].mxu1 }
 0x1ef   : > { %v856_v37 = vadd.f32 %v855_v36, %v783_v35  ;;  %v1459_v38 = vpop.f32.mrb[1].mxu1 }
 0x1f1   : > { %v859_v39 = vmax.f32 %v856_v37, 0.0 }
 0x1f3   : > { %1471 = vmatprep.subr.msk.mxu1 %vm972_vm4, %v859_v39 }
 0x1f4   : > { %1472 = vmatpush3.msk.msra.mxu1 %vm972_vm4, %v859_v39 }
 0x1f5   : > { %1474 = vmatmul.mubr.msk.f32.vlgmr.msra.gmra.mrb[4].mxu1 %vm959_vm3, %v932_v40 }
 0x1f6   : > { %v926_v44 = vpop.f32.mrb[2].mxu1  ;;  %1476 = vmatprep.mubr.msk.f32.mxu1 %vm959_vm3, %v933_v41 }
 0x1f7   : > { %v927_v45 = vadd.f32 %v926_v44, %v783_v35  ;;  %v1470_v54 = vpop.f32.mrb[3].mxu1 }
 0x1f9   : > { %v930_v47 = vmax.f32 %v927_v45, 0.0  ;;  %1477 = vmatmul.mubr.msk.f32.gmra.mrb[6].mxu1 %vm959_vm3, %v934_v55 }
 0x1fa   : > { %1481 = vmatprep.mubr.msk.f32.mxu1 %vm959_vm3, %v1089_v46 }
 0x1fb   : > { %1479 = vmatprep.subr.msk.mxu1 %vm972_vm4, %v930_v47 }
 0x1fc   : > { %1480 = vmatpush3.msk.msra.mxu1 %vm972_vm4, %v930_v47 }
 0x1fd   : > { %1482 = vmatmul.mubr.msk.f32.vlgmr.msra.gmra.mrb[8].mxu1 %vm959_vm3, %v1090_v50 }
 0x1fe   : > { %1484 = vmatprep.mubr.msk.f32.mxu1 %vm959_vm3, %v1091_v51 }
 0x201   : > { %1485 = vmatmul.mubr.msk.f32.gmra.mrb[10].mxu1 %vm959_vm3, %v1092_v42 }
 0x2c8   : > { %v1475_v48 = vpop.f32.mrb[4].mxu1 }
 0x2c9   : > { %v1048_v58 = vadd.f32 %v1475_v48, %v947_v52  ;;  %v1042_v59 = vpop.f32.mrb[5].mxu1 }
 0x2ca   : > { %v1043_v60 = vadd.f32 %v1042_v59, %v942_v43 }
 0x2cb   : > { %v1368_v61 = vmul.f32 -1.442695, %v1048_v58 }
 0x2cc   : > { %v1367_v62 = vmul.f32 -1.442695, %v1043_v60  ;;  %v1478_v63 = vpop.f32.mrb[6].mxu1 }
 0x2cd   : > { %1568 = vpow2.f32 %v1368_v61  ;;  %v1058_v0 = vadd.f32 %v1478_v63, %v957_v57  ;;  %v1052_v1 = vpop.f32.mrb[7].mxu1 }
 0x2ce   : > { %1570 = vpow2.f32 %v1367_v62  ;;  %v1053_v3 = vadd.f32 %v1052_v1, %v952_v49 }
 0x2cf   : > { %v1370_v5 = vmul.f32 -1.442695, %v1058_v0 }
 0x2d0   : > { %v1369_v6 = vmul.f32 -1.442695, %v1053_v3  ;;  %v1483_v7 = vpop.f32.mrb[8].mxu1 }
 0x2d1   : > { %1572 = vpow2.f32 %v1370_v5  ;;  %v1204_v8 = vadd.f32 %v1483_v7, %v1105_v2  ;;  %v1198_v10 = vpop.f32.mrb[9].mxu1 }
 0x2d2   : > { %1574 = vpow2.f32 %v1369_v6  ;;  %v1199_v11 = vadd.f32 %v1198_v10, %v1100_v4 }
 0x2d3   : > { %v1377_v12 = vmul.f32 -1.442695, %v1204_v8 }
 0x2d4   : > { %v1376_v14 = vmul.f32 -1.442695, %v1199_v11  ;;  %v1486_v15 = vpop.f32.mrb[10].mxu1 }
 0x2d5   : > { %1576 = vpow2.f32 %v1377_v12  ;;  %v1214_v17 = vadd.f32 %v1486_v15, %v1115_v13  ;;  %v1208_v18 = vpop.f32.mrb[11].mxu1 }
 0x2d6   : > { %1578 = vpow2.f32 %v1376_v14  ;;  %v1209_v19 = vadd.f32 %v1208_v18, %v1110_v16 }
 0x2d7   : > { %v1569_v20 = vpop.eup %1568  ;;  %v1379_v21 = vmul.f32 -1.442695, %v1214_v17 }
 0x2d8   : > { %v1571_v22 = vpop.eup %1570  ;;  %v1074_v23 = vadd.f32 1.0, %v1569_v20  ;;  %v1378_v24 = vmul.f32 -1.442695, %v1209_v19 }
 0x2d9   : > { %v1073_v25 = vadd.f32 1.0, %v1571_v22  ;;  %1580 = vpow2.f32 %v1379_v21 }
 0x2da   : > { %1582 = vrcp.f32 %v1074_v23 }
 0x2db   : > { %v1573_v26 = vpop.eup %1572  ;;  %1584 = vrcp.f32 %v1073_v25 }
 0x2dc   : > { %v1575_v27 = vpop.eup %1574  ;;  %v1076_v53 = vadd.f32 1.0, %v1573_v26  ;;  %1586 = vpow2.f32 %v1378_v24 }
 0x2dd   : > { %v1075_v28 = vadd.f32 1.0, %v1575_v27 }
 0x2de   : > { %1588 = vrcp.f32 %v1076_v53 }
 0x2df   : > { %v1577_v30 = vpop.eup %1576  ;;  %1590 = vrcp.f32 %v1075_v28 }
 0x2e0   : > { %v1579_v29 = vpop.eup %1578  ;;  %v1230_v31 = vadd.f32 1.0, %v1577_v30 }
 0x2e1   : > { %v1229_v32 = vadd.f32 1.0, %v1579_v29 }
 0x2e2   : > { %1592 = vrcp.f32 %v1230_v31 }
 0x2e3   : > { %v1581_v56 = vpop.eup %1580  ;;  %1594 = vrcp.f32 %v1229_v32 }
 0x2e4   : > { %v1583_v9 = vpop.eup %1582  ;;  %v1232_v33 = vadd.f32 1.0, %v1581_v56 }
 0x2e5   : > { %v1585_v34 = vpop.eup %1584  ;;  %1086 = vst.msk [vmem:[%s368_s14 + $0x8] sm:$0xff] %vm739_vm0, %v1583_v9 }
 0x2e6   : > { %v1587_v35 = vpop.eup %1586  ;;  %1085 = vst.msk [vmem:[%s368_s14] sm:$0xff] %vm739_vm0, %v1585_v34  ;;  %1596 = vrcp.f32 %v1232_v33 }
 0x2e7   : > { %v1231_v36 = vadd.f32 1.0, %v1587_v35 }
 0x2e8   : > { %v1589_v37 = vpop.eup %1588 }
 0x2e9   : > { %v1591_v38 = vpop.eup %1590  ;;  %1088 = vst.msk [vmem:[%s368_s14 + $0x18] sm:$0xff] %vm739_vm0, %v1589_v37  ;;  %1598 = vrcp.f32 %v1231_v36 }
 0x2ea   : > { %1087 = vst.msk [vmem:[%s368_s14 + $0x10] sm:$0xff] %vm739_vm0, %v1591_v38 }
 0x2ec   : > { %v1593_v39 = vpop.eup %1592 }
 0x2ed   : > { %v1595_v40 = vpop.eup %1594  ;;  %1242 = vst.msk [vmem:[%s373_s16 + $0x8] sm:$0xff] %vm739_vm0, %v1593_v39 }
 0x2ee   : > { %1241 = vst.msk [vmem:[%s373_s16] sm:$0xff] %vm739_vm0, %v1595_v40 }
 0x2f0   : > { %v1597_v41 = vpop.eup %1596 }
 0x2f1   : > { %1244 = vst.msk [vmem:[%s373_s16 + $0x18] sm:$0xff] %vm739_vm0, %v1597_v41 }
 0x2f3   : > { %v1599_v44 = vpop.eup %1598 }
 0x2f4   : > { %1243 = vst.msk [vmem:[%s373_s16 + $0x10] sm:$0xff] %vm739_vm0, %v1599_v44 }
 0x2f5 PF: > { %s20_s11 = sadd.s32 1, %s1622_s11   ;;  %s2083_s30 = smov %s1618_s10 }
 0x2f6   : > { %p17_p5 = scmp.ge.s32.totalorder %s20_s11, 4   ;;  %s2084_s10 = smov %s2086_s12 }
 0x2f8   :  { %19 = sbr.rel (!%p17_p5) target bundleno = 2 (0x2), region = 103 }

</bundles_post_ra>
